<compile_context>
chip_gen: v6e
topology: v6e:2x2x1
jax: 0.10.0
libtpu: 0.0.40
codegen_flags: <defaults>
</compile_context>

<pallas_src>
import math

import jax
import jax.numpy as jnp
from jax.experimental import pallas as pl
from jax.experimental.pallas import tpu as pltpu


# ----------------------------------------------------------------------------
# Kernels
# ----------------------------------------------------------------------------
def logreg_kernel_fused(x_ref, w_ref, b_ref, o_ref):
    # Single K block: o = x @ w + b, f32 accumulation on the MXU.
    acc = jnp.dot(x_ref[...], w_ref[...], preferred_element_type=jnp.float32)
    o_ref[...] = (acc + b_ref[...]).astype(o_ref.dtype)


def logreg_kernel_ktiled(x_ref, w_ref, b_ref, o_ref, acc_ref):
    # K (ft_in) reduction axis with f32 VMEM accumulator (P3 init/finalize).
    k = pl.program_id(1)

    @pl.when(k == 0)
    def _():
        acc_ref[...] = jnp.zeros_like(acc_ref)

    acc_ref[...] += jnp.dot(x_ref[...], w_ref[...],
                            preferred_element_type=jnp.float32)

    @pl.when(k == pl.num_programs(1) - 1)
    def _():
        o_ref[...] = (acc_ref[...] + b_ref[...]).astype(o_ref.dtype)


# ----------------------------------------------------------------------------
# Tiling / VMEM sizing (generation-aware)
# ----------------------------------------------------------------------------
def _round_up(x, m):
    return ((x + m - 1) // m) * m


def _vmem_budget_bytes():
    """~75% of this generation's per-core VMEM (v7x: 64 MiB, v5e/v6e: 128 MiB)."""
    try:
        cap = int(pltpu.get_tpu_info().vmem_capacity_bytes)
    except Exception:
        cap = 64 << 20  # conservative fallback: v7x-class per-TC VMEM
    return (cap * 3) // 4


def _choose_tiles(N, ft_in, nc, itemsize, budget):
    """Returns (tm, tk, nk): row tile, ft_in tile, number of K blocks."""
    sublane = max(8, 32 // itemsize)       # 8 f32, 16 bf16, 32 int8/fp8
    ncl = _round_up(nc, 128)               # physical lane width in VMEM
    tm_cap = 1024                          # amortizes ~0.35us/step grid overhead

    def max_tm(tk, w_bufs, with_acc):
        tkl = _round_up(tk, 128)
        fixed = w_bufs * tk * ncl * itemsize + 2 * ncl * 4        # weight + f32 bias
        per_row = (2 * tkl * itemsize                             # seq (double-buffered)
                   + 2 * ncl * 4                                  # out (double-buffered)
                   + (ncl * 4 if with_acc else 0))                # f32 accumulator
        avail = budget - fixed
        if avail < sublane * per_row:
            return None
        tm = min(tm_cap, _round_up(N, sublane),
                 (avail // per_row) // sublane * sublane)
        return max(tm, sublane)

    # 1) Preferred: no K tiling; weight single-buffered and VMEM-resident.
    tm = max_tm(ft_in, w_bufs=1, with_acc=False)
    if tm is not None:
        return tm, ft_in, 1

    # 2) K-tile ft_in with an exact multiple-of-128 divisor so ragged K blocks
    #    never feed garbage into the accumulator.
    tk = (ft_in // 128) * 128
    while tk >= 128:
        if ft_in % tk == 0:
            tm = max_tm(tk, w_bufs=2, with_acc=True)
            if tm is not None:
                return tm, tk, ft_in // tk
        tk -= 128
    # 3) Fallback: minimal row tile, full K.
    # TODO(synk): zero-fill ragged K tiles to allow K-tiling when ft_in has no
    # multiple-of-128 divisor.
    return sublane, ft_in, 1


def _vmem_estimate(tm, tk, nk, nc, itemsize, single_buffer):
    ncl = _round_up(nc, 128)
    tkl = _round_up(tk, 128)
    w_bufs = 1 if (nk == 1 and single_buffer) else 2
    return (w_bufs * tk * ncl * itemsize        # weight
            + 2 * ncl * 4                       # bias
            + 2 * tm * tkl * itemsize           # seq tiles (double-buffered)
            + 2 * tm * ncl * 4                  # out tiles (double-buffered)
            + (tm * ncl * 4 if nk > 1 else 0))  # f32 accumulator scratch


# ----------------------------------------------------------------------------
# pallas_call wrapper
# ----------------------------------------------------------------------------
def _pallas_logreg(seq, w_t, bias2d, *, tm, tk, nk, out_dtype, vmem_limit,
                   single_buffer):
    N, ft_in = seq.shape
    nc = w_t.shape[1]

    def resident(shape):
        # Constant index_map -> block is fetched once and stays VMEM-resident;
        # single-buffer it to halve its VMEM footprint.
        if single_buffer:
            return pl.BlockSpec(shape, lambda *_: (0,) * len(shape),
                                pipeline_mode=pl.Buffered(1))
        return pl.BlockSpec(shape, lambda *_: (0,) * len(shape))

    if nk == 1:
        grid = (pl.cdiv(N, tm),)
        in_specs = [
            pl.BlockSpec((tm, ft_in), lambda i: (i, 0)),   # seq row tile per step
            resident((ft_in, nc)),                         # weight, VMEM-resident
            resident((1, nc)),                             # bias, VMEM-resident
        ]
        out_specs = pl.BlockSpec((tm, nc), lambda i: (i, 0))
        scratch_shapes = []
        kernel = logreg_kernel_fused
        semantics = ("parallel",)
    else:
        grid = (pl.cdiv(N, tm), nk)                        # K axis last, "arbitrary"
        in_specs = [
            pl.BlockSpec((tm, tk), lambda i, k: (i, k)),   # seq tile
            pl.BlockSpec((tk, nc), lambda i, k: (k, 0)),   # weight K-slab
            resident((1, nc)),                             # bias resident
        ]
        out_specs = pl.BlockSpec((tm, nc), lambda i, k: (i, 0))
        scratch_shapes = [pltpu.VMEM((tm, nc), jnp.float32)]
        kernel = logreg_kernel_ktiled
        semantics = ("parallel", "arbitrary")

    return pl.pallas_call(
        kernel,
        out_shape=jax.ShapeDtypeStruct((N, nc), out_dtype),
        grid_spec=pltpu.PrefetchScalarGridSpec(
            num_scalar_prefetch=0,
            grid=grid,
            in_specs=in_specs,
            out_specs=out_specs,
            scratch_shapes=scratch_shapes,
        ),
        compiler_params=pltpu.CompilerParams(
            dimension_semantics=semantics,
            vmem_limit_bytes=vmem_limit,
        ),
    )(seq, w_t, bias2d)


def prepare_params(weight, bias, compute_dtype=None):
    """One-time parameter prep (hoisted out of the per-call path).

    weight: torch Linear layout [nb_classes, ft_in] -> MXU-friendly
            [ft_in, nb_classes]; bias -> [1, nb_classes] kept in f32 for the
            epilogue add on the f32 accumulator.
    """
    w_t = jnp.asarray(weight).T
    if compute_dtype is not None:
        w_t = w_t.astype(compute_dtype)
    b2d = jnp.asarray(bias, dtype=jnp.float32).reshape(1, -1)
    return w_t, b2d


def logreg_forward(seq, w_t, bias2d, *, compute_dtype=None, out_dtype=None):
    """seq: [N, ft_in]; (w_t, bias2d) from prepare_params -> [N, nb_classes]."""
    if out_dtype is None:
        out_dtype = seq.dtype
    if compute_dtype is not None and seq.dtype != compute_dtype:
        seq = seq.astype(compute_dtype)   # optional bf16 path: halves HBM streams

    N, ft_in = seq.shape
    nc = w_t.shape[1]
    assert w_t.shape[0] == ft_in and bias2d.shape == (1, nc)

    itemsize = jnp.dtype(seq.dtype).itemsize
    budget = _vmem_budget_bytes()
    tm, tk, nk = _choose_tiles(N, ft_in, nc, itemsize, budget)

    def run(single_buffer):
        est = _vmem_estimate(tm, tk, nk, nc, itemsize, single_buffer)
        vmem_limit = max(16 << 20, min(budget, int(est * 1.5)))
        return _pallas_logreg(seq, w_t, bias2d, tm=tm, tk=tk, nk=nk,
                              out_dtype=out_dtype, vmem_limit=vmem_limit,
                              single_buffer=single_buffer)

    try:
        return run(True)
    except Exception:
        # Fallback for jax builds without BlockSpec(pipeline_mode=pl.Buffered(1)):
        # default double buffering for the resident weight/bias.
        return run(False)


def xavier_uniform(key, shape, dtype=jnp.float32):
    # Matches torch.nn.init.xavier_uniform_ for a Linear weight [out, in].
    fan_out, fan_in = shape
    bound = math.sqrt(6.0 / (fan_in + fan_out))
    return jax.random.uniform(key, shape, dtype, minval=-bound, maxval=bound)


if __name__ == "__main__":
    ft_in = 32
    nb_classes = 16
    N = 8  # number of node embeddings / batch rows

    key = jax.random.PRNGKey(0)
    k_x, k_w = jax.random.split(key)

    seq = jax.random.normal(k_x, (N, ft_in), dtype=jnp.float32)
    weight = xavier_uniform(k_w, (nb_classes, ft_in))     # torch Linear weight [out, in]
    bias = jnp.zeros((nb_classes,), dtype=jnp.float32)    # bias.data.fill_(0.0)

    # One-time parameter prep (transpose hoisted out of the forward path).
    w_t, bias2d = prepare_params(weight, bias)

    out = logreg_forward(seq, w_t, bias2d)
    jax.block_until_ready(out)

    # sanity check against plain JAX reference
    ref = seq @ weight.T + bias
    assert out.shape == (N, nb_classes)
    assert jnp.allclose(out, ref, atol=1e-5, rtol=1e-5)

    print("KERNEL_OK")
</pallas_src>

<mosaic_0001>
module attributes {stable_mosaic.version = 11 : i64} {
  func.func @logreg_kernel_fused(%arg0: i32, %arg1: memref<8x32xf32, #tpu.memory_space<vmem>>, %arg2: memref<32x16xf32, #tpu.memory_space<vmem>>, %arg3: memref<1x16xf32, #tpu.memory_space<vmem>>, %arg4: memref<8x16xf32, #tpu.memory_space<vmem>>) attributes {dimension_semantics = [#tpu.dimension_semantics<parallel>], iteration_bounds = array<i64: 1>, scalar_prefetch = 0 : i64, scratch_operands = 0 : i64, tpu.core_type = #tpu.core_type<tc>, window_params = [{transform_indices = @transform_0, window_bounds = array<i64: 8, 32>}, {pipeline_mode = #tpu.pipeline_mode<synchronous>, transform_indices = @transform_1, window_bounds = array<i64: 32, 16>}, {pipeline_mode = #tpu.pipeline_mode<synchronous>, transform_indices = @transform_2, window_bounds = array<i64: 1, 16>}, {transform_indices = @transform_3, window_bounds = array<i64: 8, 16>}]} {
    %c0 = arith.constant 0 : index
    %c0_0 = arith.constant 0 : index
    %0 = vector.load %arg1[%c0, %c0_0] : memref<8x32xf32, #tpu.memory_space<vmem>>, vector<8x32xf32>
    %c0_1 = arith.constant 0 : index
    %c0_2 = arith.constant 0 : index
    %1 = vector.load %arg2[%c0_1, %c0_2] : memref<32x16xf32, #tpu.memory_space<vmem>>, vector<32x16xf32>
    %cst = arith.constant dense<0.000000e+00> : vector<8x16xf32>
    %2 = tpu.matmul %0, %1, %cst {dimension_numbers = #tpu.dot_dimension_numbers<[1], [0], [0], [1], [0, 0, 1, 1], [], []>} : vector<8x32xf32>, vector<32x16xf32>, vector<8x16xf32> -> vector<8x16xf32>
    %c0_3 = arith.constant 0 : index
    %c0_4 = arith.constant 0 : index
    %3 = vector.load %arg3[%c0_3, %c0_4] : memref<1x16xf32, #tpu.memory_space<vmem>>, vector<1x16xf32>
    %4 = vector.broadcast %3 : vector<1x16xf32> to vector<8x16xf32>
    %5 = arith.addf %2, %4 : vector<8x16xf32>
    %c0_5 = arith.constant 0 : index
    %c0_6 = arith.constant 0 : index
    %6 = vector.load %arg4[%c0_5, %c0_6] : memref<8x16xf32, #tpu.memory_space<vmem>>, vector<8x16xf32>
    tpu.vector_store %arg4[%c0_5, %c0_6], %5 {strides = array<i32>} : memref<8x16xf32, #tpu.memory_space<vmem>>, vector<8x16xf32>,
    return
  }
  func.func @transform_0(%arg0: i32) -> (i32, i32) {
    %c0_i32 = arith.constant 0 : i32
    %c0_i32_0 = arith.constant 0 : i32
    return %arg0, %c0_i32 : i32, i32
  }
  func.func @transform_1(%arg0: i32) -> (i32, i32) {
    %c0_i32 = arith.constant 0 : i32
    %c0_i32_0 = arith.constant 0 : i32
    %c0_i32_1 = arith.constant 0 : i32
    return %c0_i32, %c0_i32_0 : i32, i32
  }
  func.func @transform_2(%arg0: i32) -> (i32, i32) {
    %c0_i32 = arith.constant 0 : i32
    %c0_i32_0 = arith.constant 0 : i32
    %c0_i32_1 = arith.constant 0 : i32
    return %c0_i32, %c0_i32_0 : i32, i32
  }
  func.func @transform_3(%arg0: i32) -> (i32, i32) {
    %c0_i32 = arith.constant 0 : i32
    %c0_i32_0 = arith.constant 0 : i32
    return %arg0, %c0_i32 : i32, i32
  }
}

module attributes {stable_mosaic.version = 11 : i64} {
  func.func @logreg_kernel_fused(%arg0: i32, %arg1: memref<8x32xf32, #tpu.memory_space<vmem>>, %arg2: memref<32x16xf32, #tpu.memory_space<vmem>>, %arg3: memref<1x16xf32, #tpu.memory_space<vmem>>, %arg4: memref<8x16xf32, #tpu.memory_space<vmem>>) attributes {dimension_semantics = [#tpu.dimension_semantics<parallel>], iteration_bounds = array<i64: 1>, scalar_prefetch = 0 : i64, scratch_operands = 0 : i64, tpu.core_type = #tpu.core_type<tc>, window_params = [{transform_indices = @transform_0, window_bounds = array<i64: 8, 32>}, {pipeline_mode = #tpu.pipeline_mode<synchronous>, transform_indices = @transform_1, window_bounds = array<i64: 32, 16>}, {pipeline_mode = #tpu.pipeline_mode<synchronous>, transform_indices = @transform_2, window_bounds = array<i64: 1, 16>}, {transform_indices = @transform_3, window_bounds = array<i64: 8, 16>}]} {
    %c0 = arith.constant 0 : index
    %c0_0 = arith.constant 0 : index
    %0 = vector.load %arg1[%c0, %c0_0] : memref<8x32xf32, #tpu.memory_space<vmem>>, vector<8x32xf32>
    %c0_1 = arith.constant 0 : index
    %c0_2 = arith.constant 0 : index
    %1 = vector.load %arg2[%c0_1, %c0_2] : memref<32x16xf32, #tpu.memory_space<vmem>>, vector<32x16xf32>
    %cst = arith.constant dense<0.000000e+00> : vector<8x16xf32>
    %2 = tpu.matmul %0, %1, %cst {dimension_numbers = #tpu.dot_dimension_numbers<[1], [0], [0], [1], [0, 0, 1, 1], [], []>} : vector<8x32xf32>, vector<32x16xf32>, vector<8x16xf32> -> vector<8x16xf32>
    %c0_3 = arith.constant 0 : index
    %c0_4 = arith.constant 0 : index
    %3 = vector.load %arg3[%c0_3, %c0_4] : memref<1x16xf32, #tpu.memory_space<vmem>>, vector<1x16xf32>
    %4 = vector.broadcast %3 : vector<1x16xf32> to vector<8x16xf32>
    %5 = arith.addf %2, %4 : vector<8x16xf32>
    %c0_5 = arith.constant 0 : index
    %c0_6 = arith.constant 0 : index
    %6 = vector.load %arg4[%c0_5, %c0_6] : memref<8x16xf32, #tpu.memory_space<vmem>>, vector<8x16xf32>
    tpu.vector_store %arg4[%c0_5, %c0_6], %5 {strides = array<i32>} : memref<8x16xf32, #tpu.memory_space<vmem>>, vector<8x16xf32>,
    return
  }
  func.func @transform_0(%arg0: i32) -> (i32, i32) {
    %c0_i32 = arith.constant 0 : i32
    %c0_i32_0 = arith.constant 0 : i32
    return %arg0, %c0_i32 : i32, i32
  }
  func.func @transform_1(%arg0: i32) -> (i32, i32) {
    %c0_i32 = arith.constant 0 : i32
    %c0_i32_0 = arith.constant 0 : i32
    %c0_i32_1 = arith.constant 0 : i32
    return %c0_i32, %c0_i32_0 : i32, i32
  }
  func.func @transform_2(%arg0: i32) -> (i32, i32) {
    %c0_i32 = arith.constant 0 : i32
    %c0_i32_0 = arith.constant 0 : i32
    %c0_i32_1 = arith.constant 0 : i32
    return %c0_i32, %c0_i32_0 : i32, i32
  }
  func.func @transform_3(%arg0: i32) -> (i32, i32) {
    %c0_i32 = arith.constant 0 : i32
    %c0_i32_0 = arith.constant 0 : i32
    return %arg0, %c0_i32 : i32, i32
  }
}

</mosaic_0001>

<bundles_post_ra>
// kernel: tpu_custom_call.1
= control target key start
LH: loop header
LB: loop body
LE: loop exit
PB: predicated region body
PF: predicated region fallthrough
CT: control target
= control target key end

     0   :  { %v160_v1 = vmov 0.0   ;;  %vm161_vm0 = vmmov 0   ;;  %s204_s0 = inlined_call_operand.vmem [shape: f32[8,32], index: 0, kind: input, shape index: {}]   ;;  %s205_s1 = inlined_call_operand.vmem [shape: f32[32,16], index: 1, kind: input, shape index: {}]   ;;  %s206_s2 = inlined_call_operand.vmem [shape: f32[1,16], index: 2, kind: input, shape index: {}]   ;;  %s207_s3 = inlined_call_operand.hbm [shape: f32[8,16], index: 3, kind: output, shape index: {}]  }
   0x1   :  { %v19_v0 = vld [vmem:[%s205_s1 + $0x18] sm:$0xff]  ;;  %124 = vmatprep.subr.mxu0 %v160_v1  ;;  %v18_v2 = vld [vmem:[%s205_s1 + $0x10] sm:$0xff]  ;;  %132 = vmatprep.mubr.msk.f32.mxu0 %vm161_vm0, %v160_v1 }
   0x2   :  { %125 = vmatpush3.msra.mxu0 %v19_v0 }
   0x3   :  { %8 = vsyncpa [#allocation3], 0  ;;  %126 = vmatprep.subr.mxu0 %v160_v1  ;;  %v17_v3 = vld [vmem:[%s205_s1 + $0x8] sm:$0xff]  ;;  %v16_v4 = vld [vmem:[%s205_s1] sm:$0xff]  ;;  %vm27_vm1 = vcmask 261120   ;;  %s162_s24 = smov [#allocation2]  }
   0x4   :  { %127 = vmatpush3.msra.mxu0 %v18_v2  ;;  %v15_v5 = vld [vmem:[%s204_s0] sm:$0xff]  ;;  %s109_s25 = sshll.u32 %s162_s24, 4  ;;  %vm101_vm2 = vcmask 130048   ;;  %s110_s25 = int_to_ptr.vmem [resolvable:$true] %s109_s25 }
   0x5   :  { %128 = vmatprep.subr.mxu0 %v160_v1  ;;  %v117_v6 = vld [vmem:[%s206_s2] ss:$0 sm:$0xff]  ;;  %s138_s1 = scalar_lea.vmem %s110_s25, 128  ;;  %p143_p1 = scmp.lt.s32.totalorder %s110_s25, %s110_s25 }
   0x6   :  { %129 = vmatpush3.msra.mxu0 %v17_v3  ;;  %p139_p0 = scmp.ne.s32.totalorder %s110_s25, %s138_s1  ;;  %p144_p2 = scmp.lt.s32.totalorder %s138_s1, %s138_s1 }
   0x7   :  { %130 = vmatprep.subr.mxu0 %v160_v1 }
   0x8   :  { %131 = vmatpush3.msra.mxu0 %v16_v4  ;;  %p145_p3 = por %p144_p2, %p143_p1 }
   0x9   :  { %133 = vmatmul.mubr.msk.f32.vlgmr.msra.gmra.mxu0 %vm27_vm1, %v15_v5 }
   0xa   :  { %p146_p4 = pnand %p145_p3, %p139_p0 }
  0xc9   :  { %v97_v7 = vpop.f32.mrf.mxu0 }
  0xca   :  { %v98_v8 = vadd.f32 %v117_v6, %v97_v7 }
  0xcb   :  { %v134_v9 = vpop.f32.mrf.mxu0 }
  0xcc   :  { %102 = vst.msk [vmem:[#allocation2] sm:$0xff] %vm101_vm2, %v98_v8 }
  0xcd   :  { %149 = shalt.err (!%p146_p4)
}
  0xce   :  { %112 = dma.vmem_to_hbm [thread:$0]  %s110_s25, 128, %s207_s3, [#allocation3]  }
  0xcf   :  { %158 = dma.done.wait [#allocation3], 128  }
  0xd0   :  { %159 = vsyncadd [#allocation3], 4294967168 }
  0xd1   :  { %116 = vsyncpa [#allocation3], 1 }

// kernel: tpu_custom_call.1
= control target key start
LH: loop header
LB: loop body
LE: loop exit
PB: predicated region body
PF: predicated region fallthrough
CT: control target
= control target key end

     0   :  { %v160_v1 = vmov 0.0   ;;  %vm161_vm0 = vmmov 0   ;;  %s204_s0 = inlined_call_operand.vmem [shape: f32[8,32], index: 0, kind: input, shape index: {}]   ;;  %s205_s1 = inlined_call_operand.vmem [shape: f32[32,16], index: 1, kind: input, shape index: {}]   ;;  %s206_s2 = inlined_call_operand.vmem [shape: f32[1,16], index: 2, kind: input, shape index: {}]   ;;  %s207_s3 = inlined_call_operand.hbm [shape: f32[8,16], index: 3, kind: output, shape index: {}]  }
   0x1   :  { %v19_v0 = vld [vmem:[%s205_s1 + $0x18] sm:$0xff]  ;;  %124 = vmatprep.subr.mxu0 %v160_v1  ;;  %v18_v2 = vld [vmem:[%s205_s1 + $0x10] sm:$0xff]  ;;  %132 = vmatprep.mubr.msk.f32.mxu0 %vm161_vm0, %v160_v1 }
   0x2   :  { %125 = vmatpush3.msra.mxu0 %v19_v0 }
   0x3   :  { %8 = vsyncpa [#allocation3], 0  ;;  %126 = vmatprep.subr.mxu0 %v160_v1  ;;  %v17_v3 = vld [vmem:[%s205_s1 + $0x8] sm:$0xff]  ;;  %v16_v4 = vld [vmem:[%s205_s1] sm:$0xff]  ;;  %vm27_vm1 = vcmask 261120   ;;  %s162_s24 = smov [#allocation2]  }
   0x4   :  { %127 = vmatpush3.msra.mxu0 %v18_v2  ;;  %v15_v5 = vld [vmem:[%s204_s0] sm:$0xff]  ;;  %s109_s25 = sshll.u32 %s162_s24, 4  ;;  %vm101_vm2 = vcmask 130048   ;;  %s110_s25 = int_to_ptr.vmem [resolvable:$true] %s109_s25 }
   0x5   :  { %128 = vmatprep.subr.mxu0 %v160_v1  ;;  %v117_v6 = vld [vmem:[%s206_s2] ss:$0 sm:$0xff]  ;;  %s138_s1 = scalar_lea.vmem %s110_s25, 128  ;;  %p143_p1 = scmp.lt.s32.totalorder %s110_s25, %s110_s25 }
   0x6   :  { %129 = vmatpush3.msra.mxu0 %v17_v3  ;;  %p139_p0 = scmp.ne.s32.totalorder %s110_s25, %s138_s1  ;;  %p144_p2 = scmp.lt.s32.totalorder %s138_s1, %s138_s1 }
   0x7   :  { %130 = vmatprep.subr.mxu0 %v160_v1 }
   0x8   :  { %131 = vmatpush3.msra.mxu0 %v16_v4  ;;  %p145_p3 = por %p144_p2, %p143_p1 }
   0x9   :  { %133 = vmatmul.mubr.msk.f32.vlgmr.msra.gmra.mxu0 %vm27_vm1, %v15_v5 }
   0xa   :  { %p146_p4 = pnand %p145_p3, %p139_p0 }
  0xc9   :  { %v97_v7 = vpop.f32.mrf.mxu0 }
  0xca   :  { %v98_v8 = vadd.f32 %v117_v6, %v97_v7 }
  0xcb   :  { %v134_v9 = vpop.f32.mrf.mxu0 }
  0xcc   :  { %102 = vst.msk [vmem:[#allocation2] sm:$0xff] %vm101_vm2, %v98_v8 }
  0xcd   :  { %149 = shalt.err (!%p146_p4)
}
  0xce   :  { %112 = dma.vmem_to_hbm [thread:$0]  %s110_s25, 128, %s207_s3, [#allocation3]  }
  0xcf   :  { %158 = dma.done.wait [#allocation3], 128  }
  0xd0   :  { %159 = vsyncadd [#allocation3], 4294967168 }
  0xd1   :  { %116 = vsyncpa [#allocation3], 1 }

</bundles_post_ra>
